<compile_context>
chip_gen: v7x
topology: tpu7x:2x2x1
jax: 0.10.0
libtpu: 0.0.40
codegen_flags: <defaults>
</compile_context>

<pallas_src>
import functools

import jax
import jax.numpy as jnp
from jax.experimental import pallas as pl
from jax.experimental.pallas import tpu as pltpu


def _round_up(x, m):
    return -(-x // m) * m


def _pick_tile(dim, preferred, step):
    """Largest multiple of `step` that is <= preferred and divides `dim`."""
    t = min(preferred, dim)
    while dim % t:
        t -= step
    return t


def _softplus(x):
    # Numerically stable softplus (matches jax.nn.softplus); log1p(exp(x))
    # alone overflows for large positive x.
    return jnp.maximum(x, 0.0) + jnp.log1p(jnp.exp(-jnp.abs(x)))


# -----------------------------------------------------------------------------
# Kernel 1: reparameterized sampling of (W, b) + KL accumulation.
#   grid = (K_pad // tk, N_pad // tn) over the pre-transposed (in, out) weights.
# -----------------------------------------------------------------------------
def _sample_kl_kernel(w_mu_ref, w_rho_ref, eps_w_ref,
                      b_mu_ref, b_rho_ref, eps_b_ref,
                      w_ref, b_ref, kl_ref,
                      *, in_f, out_f, tk, tn):
    kb = pl.program_id(0)
    nb = pl.program_id(1)

    @pl.when((kb == 0) & (nb == 0))
    def _():
        # Bias is small and kept fully resident; sample it once and seed the KL.
        b_mu = b_mu_ref[...]
        b_sigma = _softplus(b_rho_ref[...])
        b_ref[...] = b_mu + b_sigma * eps_b_ref[...]
        bcol = jax.lax.broadcasted_iota(jnp.int32, b_mu.shape, 1)
        kl_b = jnp.where(
            bcol < out_f,
            -jnp.log(b_sigma) + 0.5 * (b_sigma * b_sigma + b_mu * b_mu) - 0.5,
            0.0)
        kl_ref[0, 0] = jnp.sum(kl_b)

    # Sample this weight tile.
    w_mu = w_mu_ref[...]
    w_sigma = _softplus(w_rho_ref[...])
    w_ref[...] = w_mu + w_sigma * eps_w_ref[...]

    # KL for this tile, masking padded rows/cols so padding is exactly neutral.
    row = kb * tk + jax.lax.broadcasted_iota(jnp.int32, w_mu.shape, 0)
    col = nb * tn + jax.lax.broadcasted_iota(jnp.int32, w_mu.shape, 1)
    kl_w = jnp.where(
        (row < in_f) & (col < out_f),
        -jnp.log(w_sigma) + 0.5 * (w_sigma * w_sigma + w_mu * w_mu) - 0.5,
        0.0)
    kl_ref[0, 0] += jnp.sum(kl_w)


# -----------------------------------------------------------------------------
# Kernel 2: tiled matmul + bias + ReLU with f32 accumulator scratch.
#   grid = (M_pad // tm, N_pad // tn, K_pad // tk); K is the innermost axis.
# -----------------------------------------------------------------------------
def _matmul_bias_relu_kernel(x_ref, w_ref, b_ref, y_ref, acc_ref, *, compute_dtype):
    k = pl.program_id(2)

    @pl.when(k == 0)
    def _():
        acc_ref[...] = jnp.zeros_like(acc_ref)

    acc_ref[...] += jnp.dot(x_ref[...].astype(compute_dtype),
                            w_ref[...].astype(compute_dtype),
                            preferred_element_type=jnp.float32)

    @pl.when(k == pl.num_programs(2) - 1)
    def _():
        y = acc_ref[...] + b_ref[...]
        y_ref[...] = jnp.maximum(y, 0.0).astype(y_ref.dtype)


def linear_norm_act(x, w_mu, w_rho, b_mu, b_rho, eps_w, eps_b,
                    *, compute_dtype=jnp.float32):
    """Returns (relu(bayes_linear(x)), kl_scalar).

    x:    (batch, in_features)          f32
    w_*:  (out_features, in_features)   f32  (PyTorch nn.Linear layout)
    b_*:  (1, out_features)             f32
    """
    batch, in_f = x.shape
    out_f = w_mu.shape[0]

    # Pre-transpose weights once to (in, out): MXU gets a plain (M,K)x(K,N)
    # contraction and the output stays lane-dense on out_features.
    w_mu_t, w_rho_t, eps_w_t = w_mu.T, w_rho.T, eps_w.T

    # Lane-/sublane-aligned padded sizes and tile shapes (conservative for v7x).
    M_pad = _round_up(batch, 8)
    K_pad = _round_up(in_f, 128)
    N_pad = _round_up(out_f, 128)
    tm = _pick_tile(M_pad, 256, 8)
    tk = _pick_tile(K_pad, 512, 128)
    tn = _pick_tile(N_pad, 256, 128)

    f32 = jnp.float32
    def pad2(a, rows, cols):
        return jnp.pad(a.astype(f32),
                       ((0, rows - a.shape[0]), (0, cols - a.shape[1])))

    xp      = pad2(x,       M_pad, K_pad)
    w_mu_p  = pad2(w_mu_t,  K_pad, N_pad)
    w_rho_p = pad2(w_rho_t, K_pad, N_pad)
    eps_w_p = pad2(eps_w_t, K_pad, N_pad)
    b_mu_p  = pad2(b_mu,    1,     N_pad)
    b_rho_p = pad2(b_rho,   1,     N_pad)
    eps_b_p = pad2(eps_b,   1,     N_pad)

    # ---- Kernel 1: sample W / b and accumulate KL (runs once over the weights).
    w_sampled, b_sampled, kl = pl.pallas_call(
        functools.partial(_sample_kl_kernel, in_f=in_f, out_f=out_f, tk=tk, tn=tn),
        out_shape=(
            jax.ShapeDtypeStruct((K_pad, N_pad), f32),
            jax.ShapeDtypeStruct((1, N_pad), f32),
            jax.ShapeDtypeStruct((1, 1), f32),
        ),
        grid_spec=pltpu.PrefetchScalarGridSpec(
            num_scalar_prefetch=0,
            grid=(K_pad // tk, N_pad // tn),
            in_specs=[
                pl.BlockSpec((tk, tn), lambda kb, nb: (kb, nb)),
                pl.BlockSpec((tk, tn), lambda kb, nb: (kb, nb)),
                pl.BlockSpec((tk, tn), lambda kb, nb: (kb, nb)),
                pl.BlockSpec((1, N_pad), lambda kb, nb: (0, 0)),
                pl.BlockSpec((1, N_pad), lambda kb, nb: (0, 0)),
                pl.BlockSpec((1, N_pad), lambda kb, nb: (0, 0)),
            ],
            out_specs=(
                pl.BlockSpec((tk, tn), lambda kb, nb: (kb, nb)),
                pl.BlockSpec((1, N_pad), lambda kb, nb: (0, 0)),
                pl.BlockSpec(memory_space=pltpu.MemorySpace.SMEM),  # scalar KL
            ),
        ),
        compiler_params=pltpu.CompilerParams(
            dimension_semantics=("arbitrary", "arbitrary")),
    )(w_mu_p, w_rho_p, eps_w_p, b_mu_p, b_rho_p, eps_b_p)

    # ---- Kernel 2: tiled matmul + bias + ReLU.
    y_pad = pl.pallas_call(
        functools.partial(_matmul_bias_relu_kernel, compute_dtype=compute_dtype),
        out_shape=jax.ShapeDtypeStruct((M_pad, N_pad), f32),
        grid_spec=pltpu.PrefetchScalarGridSpec(
            num_scalar_prefetch=0,
            grid=(M_pad // tm, N_pad // tn, K_pad // tk),
            in_specs=[
                pl.BlockSpec((tm, tk), lambda i, j, k: (i, k)),
                pl.BlockSpec((tk, tn), lambda i, j, k: (k, j)),
                pl.BlockSpec((1, tn), lambda i, j, k: (0, j)),
            ],
            out_specs=pl.BlockSpec((tm, tn), lambda i, j, k: (i, j)),
            scratch_shapes=[pltpu.VMEM((tm, tn), jnp.float32)],
        ),
        compiler_params=pltpu.CompilerParams(
            dimension_semantics=("parallel", "parallel", "arbitrary"),
            vmem_limit_bytes=48 * 1024 * 1024,
        ),
    )(xp, w_sampled, b_sampled)

    return y_pad[:batch, :out_f], kl[0, 0]


def _reference(x, w_mu, w_rho, b_mu, b_rho, eps_w, eps_b):
    w_sigma = jax.nn.softplus(w_rho)
    b_sigma = jax.nn.softplus(b_rho)
    w = w_mu + w_sigma * eps_w
    b = b_mu + b_sigma * eps_b
    y = jax.nn.relu(
        jnp.matmul(x, w.T, precision=jax.lax.Precision.HIGHEST) + b)
    kl = jnp.sum(-jnp.log(w_sigma) + 0.5 * (w_sigma ** 2 + w_mu ** 2) - 0.5) \
       + jnp.sum(-jnp.log(b_sigma) + 0.5 * (b_sigma ** 2 + b_mu ** 2) - 0.5)
    return y, kl


if __name__ == "__main__":
    batch, in_channels, out_channels = 8, 32, 16

    key = jax.random.PRNGKey(0)
    kx, kw, kb, kew, keb = jax.random.split(key, 5)

    x = jax.random.normal(kx, (batch, in_channels), dtype=jnp.float32)

    # Deterministic parameter init (synthetic; mirrors BayesLinear parameter shapes).
    w_mu = jax.random.normal(kw, (out_channels, in_channels), dtype=jnp.float32) * 0.1
    w_rho = jnp.full((out_channels, in_channels), -3.0, dtype=jnp.float32)
    b_mu = jax.random.normal(kb, (1, out_channels), dtype=jnp.float32) * 0.1
    b_rho = jnp.full((1, out_channels), -3.0, dtype=jnp.float32)

    # Reparameterization noise (deterministic draw).
    eps_w = jax.random.normal(kew, (out_channels, in_channels), dtype=jnp.float32)
    eps_b = jax.random.normal(keb, (1, out_channels), dtype=jnp.float32)

    y, kl = linear_norm_act(x, w_mu, w_rho, b_mu, b_rho, eps_w, eps_b)
    jax.block_until_ready((y, kl))

    y_ref, kl_ref = _reference(x, w_mu, w_rho, b_mu, b_rho, eps_w, eps_b)
    assert y.shape == (batch, out_channels)
    assert jnp.allclose(y, y_ref, atol=1e-5, rtol=1e-5)
    assert jnp.allclose(kl, kl_ref, atol=1e-3, rtol=1e-5)

    print("KERNEL_OK")
</pallas_src>

<mosaic_0001>
module attributes {stable_mosaic.version = 11 : i64} {
  func.func @_sample_kl_kernel(%arg0: i32, %arg1: i32, %arg2: memref<128x128xf32, #tpu.memory_space<vmem>>, %arg3: memref<128x128xf32, #tpu.memory_space<vmem>>, %arg4: memref<128x128xf32, #tpu.memory_space<vmem>>, %arg5: memref<1x128xf32, #tpu.memory_space<vmem>>, %arg6: memref<1x128xf32, #tpu.memory_space<vmem>>, %arg7: memref<1x128xf32, #tpu.memory_space<vmem>>, %arg8: memref<128x128xf32, #tpu.memory_space<vmem>>, %arg9: memref<1x128xf32, #tpu.memory_space<vmem>>, %arg10: memref<1x1xf32, #tpu.memory_space<smem>>) attributes {dimension_semantics = [#tpu.dimension_semantics<arbitrary>, #tpu.dimension_semantics<arbitrary>], iteration_bounds = array<i64: 1, 1>, scalar_prefetch = 0 : i64, scratch_operands = 0 : i64, tpu.core_type = #tpu.core_type<tc>, window_params = [{transform_indices = @transform_0, window_bounds = array<i64: 128, 128>}, {transform_indices = @transform_1, window_bounds = array<i64: 128, 128>}, {transform_indices = @transform_2, window_bounds = array<i64: 128, 128>}, {pipeline_mode = #tpu.pipeline_mode<synchronous>, transform_indices = @transform_3, window_bounds = array<i64: 1, 128>}, {pipeline_mode = #tpu.pipeline_mode<synchronous>, transform_indices = @transform_4, window_bounds = array<i64: 1, 128>}, {pipeline_mode = #tpu.pipeline_mode<synchronous>, transform_indices = @transform_5, window_bounds = array<i64: 1, 128>}, {transform_indices = @transform_6, window_bounds = array<i64: 128, 128>}, {pipeline_mode = #tpu.pipeline_mode<synchronous>, transform_indices = @transform_7, window_bounds = array<i64: 1, 128>}, {transform_indices = @transform_8, window_bounds = array<i64: 1, 1>}]} {
    %c0_i32 = arith.constant 0 : i32
    %0 = arith.cmpi eq, %arg0, %c0_i32 : i32
    %c0_i32_0 = arith.constant 0 : i32
    %1 = arith.cmpi eq, %arg1, %c0_i32_0 : i32
    %2 = arith.andi %0, %1 : i1
    %3 = arith.extui %2 : i1 to i32
    %c0_i32_1 = arith.constant 0 : i32
    %4 = arith.cmpi ne, %3, %c0_i32_1 : i32
    scf.if %4 {
      %c0_20 = arith.constant 0 : index
      %c0_21 = arith.constant 0 : index
      %52 = vector.load %arg5[%c0_20, %c0_21] : memref<1x128xf32, #tpu.memory_space<vmem>>, vector<1x128xf32>
      %c0_22 = arith.constant 0 : index
      %c0_23 = arith.constant 0 : index
      %53 = vector.load %arg6[%c0_22, %c0_23] : memref<1x128xf32, #tpu.memory_space<vmem>>, vector<1x128xf32>
      %cst_24 = arith.constant 0.000000e+00 : f32
      %54 = vector.broadcast %cst_24 : f32 to vector<1x128xf32>
      %55 = arith.maximumf %53, %54 : vector<1x128xf32>
      %56 = math.absf %53 : vector<1x128xf32>
      %cst_25 = arith.constant 0.000000e+00 : f32
      %57 = vector.broadcast %cst_25 : f32 to vector<1x128xf32>
      %58 = arith.subf %57, %56 : vector<1x128xf32>
      %59 = math.exp %58 : vector<1x128xf32>
      %60 = math.log1p %59 : vector<1x128xf32>
      %61 = arith.addf %55, %60 : vector<1x128xf32>
      %c0_26 = arith.constant 0 : index
      %c0_27 = arith.constant 0 : index
      %62 = vector.load %arg7[%c0_26, %c0_27] : memref<1x128xf32, #tpu.memory_space<vmem>>, vector<1x128xf32>
      %63 = arith.mulf %61, %62 : vector<1x128xf32>
      %64 = arith.addf %52, %63 : vector<1x128xf32>
      %c0_28 = arith.constant 0 : index
      %c0_29 = arith.constant 0 : index
      %65 = vector.load %arg9[%c0_28, %c0_29] : memref<1x128xf32, #tpu.memory_space<vmem>>, vector<1x128xf32>
      tpu.vector_store %arg9[%c0_28, %c0_29], %64 {strides = array<i32>} : memref<1x128xf32, #tpu.memory_space<vmem>>, vector<1x128xf32>,
      %66 = tpu.iota {dimensions = array<i32: 1>} : vector<1x128xi32>
      %c16_i32_30 = arith.constant 16 : i32
      %67 = vector.broadcast %c16_i32_30 : i32 to vector<1x128xi32>
      %68 = arith.cmpi slt, %66, %67 : vector<1x128xi32>
      %69 = math.log %61 : vector<1x128xf32>
      %cst_31 = arith.constant 0.000000e+00 : f32
      %70 = vector.broadcast %cst_31 : f32 to vector<1x128xf32>
      %71 = arith.subf %70, %69 : vector<1x128xf32>
      %72 = arith.mulf %61, %61 : vector<1x128xf32>
      %73 = arith.mulf %52, %52 : vector<1x128xf32>
      %74 = arith.addf %72, %73 : vector<1x128xf32>
      %cst_32 = arith.constant 5.000000e-01 : f32
      %75 = vector.broadcast %cst_32 : f32 to vector<1x128xf32>
      %76 = arith.mulf %75, %74 : vector<1x128xf32>
      %77 = arith.addf %71, %76 : vector<1x128xf32>
      %cst_33 = arith.constant 5.000000e-01 : f32
      %78 = vector.broadcast %cst_33 : f32 to vector<1x128xf32>
      %79 = arith.subf %77, %78 : vector<1x128xf32>
      %cst_34 = arith.constant 0.000000e+00 : f32
      %80 = vector.broadcast %cst_34 : f32 to vector<1x128xf32>
      %81 = arith.select %68, %79, %80 : vector<1x128xi1>, vector<1x128xf32>
      %82 = vector.shape_cast %81 : vector<1x128xf32> to vector<1x1x128xf32>
      %cst_35 = arith.constant dense<0.000000e+00> : vector<1xf32>
      %83 = vector.multi_reduction <add>, %82, %cst_35 [1, 2] : vector<1x1x128xf32> to vector<1xf32>
      %84 = vector.shape_cast %83 : vector<1xf32> to vector<1x1x1xf32>
      %85 = vector.extract %84[0, 0, 0] : f32 from vector<1x1x1xf32>
      %c0_36 = arith.constant 0 : index
      %c0_37 = arith.constant 0 : index
      %86 = memref.load %arg10[%c0_36, %c0_37] : memref<1x1xf32, #tpu.memory_space<smem>>
      memref.store %85, %arg10[%c0_36, %c0_37] : memref<1x1xf32, #tpu.memory_space<smem>>
    } else {
    }
    %c0 = arith.constant 0 : index
    %c0_2 = arith.constant 0 : index
    %5 = vector.load %arg2[%c0, %c0_2] : memref<128x128xf32, #tpu.memory_space<vmem>>, vector<128x128xf32>
    %c0_3 = arith.constant 0 : index
    %c0_4 = arith.constant 0 : index
    %6 = vector.load %arg3[%c0_3, %c0_4] : memref<128x128xf32, #tpu.memory_space<vmem>>, vector<128x128xf32>
    %cst = arith.constant 0.000000e+00 : f32
    %7 = vector.broadcast %cst : f32 to vector<128x128xf32>
    %8 = arith.maximumf %6, %7 : vector<128x128xf32>
    %9 = math.absf %6 : vector<128x128xf32>
    %cst_5 = arith.constant 0.000000e+00 : f32
    %10 = vector.broadcast %cst_5 : f32 to vector<128x128xf32>
    %11 = arith.subf %10, %9 : vector<128x128xf32>
    %12 = math.exp %11 : vector<128x128xf32>
    %13 = math.log1p %12 : vector<128x128xf32>
    %14 = arith.addf %8, %13 : vector<128x128xf32>
    %c0_6 = arith.constant 0 : index
    %c0_7 = arith.constant 0 : index
    %15 = vector.load %arg4[%c0_6, %c0_7] : memref<128x128xf32, #tpu.memory_space<vmem>>, vector<128x128xf32>
    %16 = arith.mulf %14, %15 : vector<128x128xf32>
    %17 = arith.addf %5, %16 : vector<128x128xf32>
    %c0_8 = arith.constant 0 : index
    %c0_9 = arith.constant 0 : index
    %18 = vector.load %arg8[%c0_8, %c0_9] : memref<128x128xf32, #tpu.memory_space<vmem>>, vector<128x128xf32>
    tpu.vector_store %arg8[%c0_8, %c0_9], %17 {strides = array<i32>} : memref<128x128xf32, #tpu.memory_space<vmem>>, vector<128x128xf32>,
    %c128_i32 = arith.constant 128 : i32
    %19 = arith.muli %arg0, %c128_i32 : i32
    %20 = tpu.iota {dimensions = array<i32: 0>} : vector<128x128xi32>
    %21 = vector.broadcast %19 : i32 to vector<128x128xi32>
    %22 = arith.addi %21, %20 : vector<128x128xi32>
    %c128_i32_10 = arith.constant 128 : i32
    %23 = arith.muli %arg1, %c128_i32_10 : i32
    %24 = tpu.iota {dimensions = array<i32: 1>} : vector<128x128xi32>
    %25 = vector.broadcast %23 : i32 to vector<128x128xi32>
    %26 = arith.addi %25, %24 : vector<128x128xi32>
    %c32_i32 = arith.constant 32 : i32
    %27 = vector.broadcast %c32_i32 : i32 to vector<128x128xi32>
    %28 = arith.cmpi slt, %22, %27 : vector<128x128xi32>
    %c16_i32 = arith.constant 16 : i32
    %29 = vector.broadcast %c16_i32 : i32 to vector<128x128xi32>
    %30 = arith.cmpi slt, %26, %29 : vector<128x128xi32>
    %31 = arith.andi %28, %30 : vector<128x128xi1>
    %32 = math.log %14 : vector<128x128xf32>
    %cst_11 = arith.constant 0.000000e+00 : f32
    %33 = vector.broadcast %cst_11 : f32 to vector<128x128xf32>
    %34 = arith.subf %33, %32 : vector<128x128xf32>
    %35 = arith.mulf %14, %14 : vector<128x128xf32>
    %36 = arith.mulf %5, %5 : vector<128x128xf32>
    %37 = arith.addf %35, %36 : vector<128x128xf32>
    %cst_12 = arith.constant 5.000000e-01 : f32
    %38 = vector.broadcast %cst_12 : f32 to vector<128x128xf32>
    %39 = arith.mulf %38, %37 : vector<128x128xf32>
    %40 = arith.addf %34, %39 : vector<128x128xf32>
    %cst_13 = arith.constant 5.000000e-01 : f32
    %41 = vector.broadcast %cst_13 : f32 to vector<128x128xf32>
    %42 = arith.subf %40, %41 : vector<128x128xf32>
    %cst_14 = arith.constant 0.000000e+00 : f32
    %43 = vector.broadcast %cst_14 : f32 to vector<128x128xf32>
    %44 = arith.select %31, %42, %43 : vector<128x128xi1>, vector<128x128xf32>
    %c0_15 = arith.constant 0 : index
    %c0_16 = arith.constant 0 : index
    %45 = memref.load %arg10[%c0_15, %c0_16] : memref<1x1xf32, #tpu.memory_space<smem>>
    %46 = vector.shape_cast %44 : vector<128x128xf32> to vector<1x128x128xf32>
    %cst_17 = arith.constant dense<0.000000e+00> : vector<1xf32>
    %47 = vector.multi_reduction <add>, %46, %cst_17 [1, 2] : vector<1x128x128xf32> to vector<1xf32>
    %48 = vector.shape_cast %47 : vector<1xf32> to vector<1x1x1xf32>
    %49 = vector.extract %48[0, 0, 0] : f32 from vector<1x1x1xf32>
    %50 = arith.addf %45, %49 : f32
    %c0_18 = arith.constant 0 : index
    %c0_19 = arith.constant 0 : index
    %51 = memref.load %arg10[%c0_18, %c0_19] : memref<1x1xf32, #tpu.memory_space<smem>>
    memref.store %50, %arg10[%c0_18, %c0_19] : memref<1x1xf32, #tpu.memory_space<smem>>
    return
  }
  func.func @transform_0(%arg0: i32, %arg1: i32) -> (i32, i32) {
    %c0_i32 = arith.constant 0 : i32
    return %arg0, %arg1 : i32, i32
  }
  func.func @transform_1(%arg0: i32, %arg1: i32) -> (i32, i32) {
    %c0_i32 = arith.constant 0 : i32
    return %arg0, %arg1 : i32, i32
  }
  func.func @transform_2(%arg0: i32, %arg1: i32) -> (i32, i32) {
    %c0_i32 = arith.constant 0 : i32
    return %arg0, %arg1 : i32, i32
  }
  func.func @transform_3(%arg0: i32, %arg1: i32) -> (i32, i32) {
    %c0_i32 = arith.constant 0 : i32
    %c0_i32_0 = arith.constant 0 : i32
    %c0_i32_1 = arith.constant 0 : i32
    return %c0_i32, %c0_i32_0 : i32, i32
  }
  func.func @transform_4(%arg0: i32, %arg1: i32) -> (i32, i32) {
    %c0_i32 = arith.constant 0 : i32
    %c0_i32_0 = arith.constant 0 : i32
    %c0_i32_1 = arith.constant 0 : i32
    return %c0_i32, %c0_i32_0 : i32, i32
  }
  func.func @transform_5(%arg0: i32, %arg1: i32) -> (i32, i32) {
    %c0_i32 = arith.constant 0 : i32
    %c0_i32_0 = arith.constant 0 : i32
    %c0_i32_1 = arith.constant 0 : i32
    return %c0_i32, %c0_i32_0 : i32, i32
  }
  func.func @transform_6(%arg0: i32, %arg1: i32) -> (i32, i32) {
    %c0_i32 = arith.constant 0 : i32
    return %arg0, %arg1 : i32, i32
  }
  func.func @transform_7(%arg0: i32, %arg1: i32) -> (i32, i32) {
    %c0_i32 = arith.constant 0 : i32
    %c0_i32_0 = arith.constant 0 : i32
    %c0_i32_1 = arith.constant 0 : i32
    return %c0_i32, %c0_i32_0 : i32, i32
  }
  func.func @transform_8(%arg0: i32, %arg1: i32) -> (i32, i32) {
    %c0_i32 = arith.constant 0 : i32
    %c0_i32_0 = arith.constant 0 : i32
    %c0_i32_1 = arith.constant 0 : i32
    return %c0_i32, %c0_i32_0 : i32, i32
  }
}

</mosaic_0001>

<bundles_post_ra>
// kernel: tpu_custom_call.1
= control target key start
LH: loop header
LB: loop body
LE: loop exit
PB: predicated region body
PF: predicated region fallthrough
CT: control target
= control target key end

     0   :  { %14 = vsyncpa [#allocation3], 0  ;;  %s1456_s0 = inlined_call_operand.hbm [shape: f32[128,128], index: 0, kind: input, shape index: {}]   ;;  %s1457_s1 = inlined_call_operand.hbm [shape: f32[128,128], index: 1, kind: input, shape index: {}]   ;;  %s1458_s2 = inlined_call_operand.hbm [shape: f32[128,128], index: 2, kind: input, shape index: {}]   ;;  %s1459_s3 = inlined_call_operand.vmem [shape: f32[1,128], index: 3, kind: input, shape index: {}]   ;;  %s1460_s4 = inlined_call_operand.vmem [shape: f32[1,128], index: 4, kind: input, shape index: {}]   ;;  %s1461_s5 = inlined_call_operand.vmem [shape: f32[1,128], index: 5, kind: input, shape index: {}]   ;;  %s1462_s6 = inlined_call_operand.hbm [shape: f32[128,128], index: 6, kind: output, shape index: {0}]   ;;  %s1463_s7 = inlined_call_operand.hbm [shape: f32[1,128], index: 7, kind: output, shape index: {1}]   ;;  %s1464_s8 = inlined_call_operand.hbm [shape: f32[1,1], index: 8, kind: output, shape index: {2}]  }
   0x1   :  { %15 = vsyncpa [#allocation7], 0 }
   0x2   :  { %16 = vsyncpa [#allocation4], 0 }
   0x3   :  { %17 = vsyncpa [#allocation11], 0 }
   0x4   :  { %18 = vsyncpa [#allocation5], 0  ;;  %s1002_s27 = smov [#allocation6]   ;;  %s1003_s29 = smov [#allocation2]  }
   0x5   :  { %s36_s28 = sshll.u32 %s1002_s27, 4  ;;  %s24_s30 = sshll.u32 %s1003_s29, 4  ;;  %s37_s28 = int_to_ptr.vmem [resolvable:$true] %s36_s28  ;;  %s1055_s30 = int_to_ptr.vmem [resolvable:$true] %s24_s30 }
   0x6   :  { %s872_s11 = scalar_lea.hbm %s1457_s1, 2048 }
   0x7   :  { %p873_p0 = scmp.ne.s32.totalorder %s1457_s1, %s872_s11  ;;  %p876_p1 = scmp.lt.u32.totalorder %s872_s11, %s1457_s1 }
   0x9   :  { %p878_p2 = pnand %p876_p1, %p873_p0 }
   0xb   :  { %881 = shalt.err (!%p878_p2)
}
   0xc   :  { %s882_s16 = scalar_lea.vmem %s37_s28, 2048  ;;  %p887_p4 = scmp.lt.s32.totalorder %s37_s28, %s37_s28 }
   0xd   :  { %p883_p3 = scmp.ne.s32.totalorder %s37_s28, %s882_s16  ;;  %p888_p5 = scmp.lt.s32.totalorder %s882_s16, %s882_s16 }
   0xf   :  { %p889_p6 = por %p888_p5, %p887_p4 }
  0x11   :  { %p890_p7 = pnand %p889_p6, %p883_p3 }
  0x13   :  { %893 = shalt.err (!%p890_p7)
}
  0x14   :  { %s1004_s17 = smov 128   ;;  %s1005_s18 = smov 8  }
  0x15   :  { %42 = dma.hbm_to_vmem [thread:$0]  %s1457_s1, 2048, %s37_s28, [#allocation7], %s1004_s17, %s1004_s17, %s1005_s18  }
  0x16   :  { %s894_s23 = scalar_lea.hbm %s1456_s0, 2048 }
  0x17   :  { %p895_p8 = scmp.ne.s32.totalorder %s1456_s0, %s894_s23  ;;  %p898_p9 = scmp.lt.u32.totalorder %s894_s23, %s1456_s0 }
  0x19   :  { %p900_p10 = pnand %p898_p9, %p895_p8 }
  0x1b   :  { %903 = shalt.err (!%p900_p10)
}
  0x1c   :  { %s904_s29 = scalar_lea.vmem %s1055_s30, 2048  ;;  %p909_p12 = scmp.lt.s32.totalorder %s1055_s30, %s1055_s30 }
  0x1d   :  { %p905_p11 = scmp.ne.s32.totalorder %s1055_s30, %s904_s29  ;;  %p910_p13 = scmp.lt.s32.totalorder %s904_s29, %s904_s29 }
  0x1f   :  { %p911_p0 = por %p910_p13, %p909_p12 }
  0x21   :  { %p912_p1 = pnand %p911_p0, %p905_p11 }
  0x23   :  { %915 = shalt.err (!%p912_p1)
}
  0x24   :  { %30 = dma.hbm_to_vmem [thread:$0]  %s1456_s0, 2048, %s1055_s30, [#allocation3], %s1004_s17, %s1004_s17, %s1005_s18  }
  0x25   :  { %s1006_s9 = smov [#allocation8]   ;;  %s916_s13 = scalar_lea.hbm %s1458_s2, 2048 }
  0x26   :  { %s48_s10 = sshll.u32 %s1006_s9, 4  ;;  %p917_p2 = scmp.ne.s32.totalorder %s1458_s2, %s916_s13  ;;  %s49_s10 = int_to_ptr.vmem [resolvable:$true] %s48_s10 }
  0x27   :  { %p920_p3 = scmp.lt.u32.totalorder %s916_s13, %s1458_s2 }
  0x29   :  { %p922_p4 = pnand %p920_p3, %p917_p2 }
  0x2b   :  { %925 = shalt.err (!%p922_p4)
}
  0x2c   :  { %s926_s20 = scalar_lea.vmem %s49_s10, 2048  ;;  %p931_p6 = scmp.lt.s32.totalorder %s49_s10, %s49_s10 }
  0x2d   :  { %p927_p5 = scmp.ne.s32.totalorder %s49_s10, %s926_s20  ;;  %p932_p7 = scmp.lt.s32.totalorder %s926_s20, %s926_s20 }
  0x2f   :  { %p933_p8 = por %p932_p7, %p931_p6 }
  0x31   :  { %p934_p9 = pnand %p933_p8, %p927_p5 }
  0x33   :  { %937 = shalt.err (!%p934_p9)
}
  0x34   :  { %54 = dma.hbm_to_vmem [thread:$0]  %s1458_s2, 2048, %s49_s10, [#allocation7], %s1004_s17, %s1004_s17, %s1005_s18  }
  0x35   :  { %992 = dma.done.wait [#allocation3], 2048  }
  0x36   :  { %993 = vsyncadd [#allocation3], 4294965248 }
  0x37   :  { %994 = dma.done.wait [#allocation7], 4096  }
  0x38   :  { %995 = vsyncadd [#allocation7], 4294963200  ;;  %v1110_v0 = vld [vmem:[%s1460_s4] sm:$0x1]  ;;  %v1115_v3 = vld [vmem:[#allocation6 + $0x8] sm:$0xff]  ;;  %vm110_vm6 = vcmask 1040384  }
  0x39   :  { %v79_v1 = vand.u32 2147483647, %v1110_v0  ;;  %v1113_v2 = vld [vmem:[#allocation6] sm:$0xff]  ;;  %v1117_v4 = vld [vmem:[#allocation6 + $0x10] sm:$0xff]  ;;  %v1119_v6 = vld [vmem:[#allocation6 + $0x18] sm:$0xff]  ;;  %v78_v42 = vmax.f32 %v1110_v0, 0.0 }
  0x3a   :  { %v171_v7 = vand.u32 2147483647, %v1113_v2  ;;  %v172_v8 = vand.u32 2147483647, %v1115_v3  ;;  %v173_v10 = vand.u32 2147483647, %v1117_v4 }
  0x3b   :  { %v80_v5 = vsub.f32 0.0, %v79_v1  ;;  %v174_v11 = vand.u32 2147483647, %v1119_v6  ;;  %v1133_v48 = vld [vmem:[%s1459_s3] sm:$0x1]  ;;  %v155_v49 = vmax.f32 %v1113_v2, 0.0 }
  0x3c   :  { %v187_v12 = vsub.f32 0.0, %v171_v7  ;;  %v188_v13 = vsub.f32 0.0, %v172_v8  ;;  %v189_v14 = vsub.f32 0.0, %v173_v10  ;;  %v156_v50 = vmax.f32 %v1115_v3, 0.0  ;;  %s1007_s24 = smov [#allocation10]  }
  0x3d   :  { %v81_v9 = vmul.f32 1.442695, %v80_v5  ;;  %v190_v15 = vsub.f32 0.0, %v174_v11  ;;  %v104_v0 = vmul.f32 %v1133_v48, %v1133_v48  ;;  %v157_v1 = vmax.f32 %v1117_v4, 0.0  ;;  %v123_v11 = vld [vmem:[#allocation2] sm:$0xff]  ;;  %s738_s25 = sshll.u32 %s1007_s24, 4  ;;  %s1387_s25 = int_to_ptr.vmem [resolvable:$true] %s738_s25 }
  0x3e   :  { %v203_v16 = vmul.f32 1.442695, %v187_v12  ;;  %v205_v17 = vmul.f32 1.442695, %v188_v13  ;;  %v207_v18 = vmul.f32 1.442695, %v189_v14  ;;  %p943_p11 = scmp.lt.s32.totalorder %s1387_s25, %s1387_s25 }
  0x3f   :  { %794 = vpow2.f32 %v81_v9  ;;  %v209_v19 = vmul.f32 1.442695, %v190_v15  ;;  %v395_v9 = vld [vmem:[#allocation8] sm:$0xff]  ;;  %v158_v12 = vmax.f32 %v1119_v6, 0.0  ;;  %v396_v15 = vld [vmem:[#allocation8 + $0x8] sm:$0xff]  ;;  %s942_s26 = scalar_lea.vmem %s1387_s25, 32 }
  0x40   :  { %796 = vpow2.f32 %v203_v16 }
  0x41   :  { %798 = vpow2.f32 %v205_v17 }
  0x42   :  { %800 = vpow2.f32 %v207_v18 }
  0x43   :  { %802 = vpow2.f32 %v209_v19 }
  0x49   :  { %v795_v20 = vpop.eup %794 }
  0x4a   :  { %v83_v21 = vadd.f32 1.0, %v795_v20  ;;  %v797_v22 = vpop.eup %796  ;;  %v86_v24 = vmul.f32 -0.5, %v795_v20  ;;  %v89_v34 = vand.u32 2147483647, %v795_v20 }
  0x4b   :  { %v799_v23 = vpop.eup %798  ;;  %v235_v25 = vadd.f32 1.0, %v797_v22  ;;  %v238_v30 = vmul.f32 -0.5, %v797_v22  ;;  %v241_v39 = vand.u32 2147483647, %v797_v22 }
  0x4c   :  { %804 = vlog2.f32 %v83_v21  ;;  %v801_v26 = vpop.eup %800  ;;  %v244_v27 = vadd.f32 1.0, %v799_v23  ;;  %v87_v31 = vadd.f32 1.0, %v86_v24  ;;  %v247_v32 = vmul.f32 -0.5, %v799_v23  ;;  %v124_v21 = vld [vmem:[#allocation2 + $0x8] sm:$0xff]  ;;  %v398_v24 = vld [vmem:[#allocation8 + $0x18] sm:$0xff] }
  0x4d   :  { %v803_v28 = vpop.eup %802  ;;  %806 = vlog2.f32 %v235_v25  ;;  %v253_v29 = vadd.f32 1.0, %v801_v26  ;;  %v256_v35 = vmul.f32 -0.5, %v801_v26  ;;  %v239_v36 = vadd.f32 1.0, %v238_v30 }
  0x4e   :  { %808 = vlog2.f32 %v244_v27  ;;  %v262_v33 = vadd.f32 1.0, %v803_v28  ;;  %v265_v37 = vmul.f32 -0.5, %v803_v28  ;;  %v88_v38 = vmul.f32 %v795_v20, %v87_v31  ;;  %v397_v20 = vld [vmem:[#allocation8 + $0x10] sm:$0xff] }
  0x4f   :  { %810 = vlog2.f32 %v253_v29  ;;  %v248_v40 = vadd.f32 1.0, %v247_v32  ;;  %vm1126_vm0 = vcmp.lt.f32.partialorder %v89_v34, 0.0004427343  ;;  %v250_v44 = vand.u32 2147483647, %v799_v23  ;;  %v125_v27 = vld [vmem:[#allocation2 + $0x10] sm:$0xff] }
  0x50   :  { %812 = vlog2.f32 %v262_v33  ;;  %v257_v45 = vadd.f32 1.0, %v256_v35  ;;  %v259_v47 = vand.u32 2147483647, %v801_v26  ;;  %v240_v51 = vmul.f32 %v797_v22, %v239_v36  ;;  %v126_v35 = vld [vmem:[#allocation2 + $0x18] sm:$0xff] }
  0x51   :  { %v266_v52 = vadd.f32 1.0, %v265_v37  ;;  %vm1139_vm1 = vcmp.lt.f32.partialorder %v241_v39, 0.0004427343  ;;  %v249_v56 = vmul.f32 %v799_v23, %v248_v40  ;;  %v268_v57 = vand.u32 2147483647, %v803_v28 }
  0x52   :  { %vm1145_vm2 = vcmp.lt.f32.partialorder %v250_v44, 0.0004427343  ;;  %v258_v62 = vmul.f32 %v801_v26, %v257_v45  ;;  %vm1152_vm3 = vcmp.lt.f32.partialorder %v259_v47, 0.0004427343  ;;  %v596_v26 = vmul.f32 %v123_v11, %v123_v11 }
  0x53   :  { %v267_v8 = vmul.f32 %v803_v28, %v266_v52  ;;  %vm1162_vm4 = vcmp.lt.f32.partialorder %v268_v57, 0.0004427343  ;;  %v597_v34 = vmul.f32 %v124_v21, %v124_v21  ;;  %v97_v39 = vlaneseq }
  0x54   :  { %v599_v45 = vmul.f32 %v126_v35, %v126_v35 }
  0x56   :  { %v805_v41 = vpop.eup %804 }
  0x57   :  { %v85_v46 = vmul.f32 0.6931472, %v805_v41  ;;  %v807_v53 = vpop.eup %806  ;;  %v598_v41 = vmul.f32 %v125_v27, %v125_v27 }
  0x58   :  { %v809_v58 = vpop.eup %808  ;;  %v237_v60 = vmul.f32 0.6931472, %v807_v53 }
  0x59   :  { %v91_v54 = vsel %vm1126_vm0, %v88_v38, %v85_v46  ;;  %v811_v63 = vpop.eup %810  ;;  %v246_v2 = vmul.f32 0.6931472, %v809_v58 }
  0x5a   :  { %v1143_v59 = vadd.f32 %v91_v54, %v78_v42  ;;  %v243_v5 = vsel %vm1139_vm1, %v240_v51, %v237_v60  ;;  %v255_v7 = vmul.f32 0.6931472, %v811_v63  ;;  %v813_v10 = vpop.eup %812  ;;  %v98_v51 = vand.u32 127, %v97_v39 }
  0x5b   :  { %v252_v4 = vsel %vm1145_vm2, %v249_v56, %v246_v2  ;;  %v379_v14 = vadd.f32 %v243_v5, %v155_v49  ;;  %v264_v18 = vmul.f32 0.6931472, %v813_v10 }
  0x5c   :  { %814 = vlog2.f32 %v1143_v59  ;;  %v103_v16 = vmul.f32 %v1143_v59, %v1143_v59  ;;  %v261_v17 = vsel %vm1152_vm3, %v258_v62, %v255_v7  ;;  %v380_v19 = vadd.f32 %v252_v4, %v156_v50 }
  0x5d   :  { %v381_v6 = vadd.f32 %v261_v17, %v157_v1  ;;  %v411_v22 = vmul.f32 %v395_v9, %v379_v14  ;;  %816 = vlog2.f32 %v379_v14  ;;  %v270_v23 = vsel %vm1162_vm4, %v267_v8, %v264_v18 }
  0x5e   :  { %v412_v25 = vmul.f32 %v396_v15, %v380_v19  ;;  %818 = vlog2.f32 %v380_v19  ;;  %v382_v28 = vadd.f32 %v270_v23, %v158_v12  ;;  %v105_v31 = vadd.f32 %v104_v0, %v103_v16 }
  0x5f   :  { %v413_v29 = vmul.f32 %v397_v20, %v381_v6  ;;  %v427_v30 = vadd.f32 %v411_v22, %v123_v11  ;;  %820 = vlog2.f32 %v381_v6  ;;  %v580_v33 = vmul.f32 %v379_v14, %v379_v14 }
  0x60   :  { %v428_v32 = vadd.f32 %v412_v25, %v124_v21  ;;  %v414_v36 = vmul.f32 %v398_v24, %v382_v28  ;;  %822 = vlog2.f32 %v382_v28  ;;  %v581_v38 = vmul.f32 %v380_v19, %v380_v19 }
  0x61   :  { %v429_v37 = vadd.f32 %v413_v29, %v125_v27  ;;  %443 = vst [vmem:[#allocation9] sm:$0xff] %v427_v30  ;;  %v582_v40 = vmul.f32 %v381_v6, %v381_v6  ;;  %v583_v44 = vmul.f32 %v382_v28, %v382_v28  ;;  %v612_v46 = vadd.f32 %v596_v26, %v580_v33  ;;  %v1177_v27 = vld [vmem:[#allocation6 + $0x20] sm:$0xff]  ;;  %v1179_v28 = vld [vmem:[#allocation6 + $0x28] sm:$0xff]  ;;  %v1181_v29 = vld [vmem:[#allocation6 + $0x30] sm:$0xff] }
  0x62   :  { %444 = vst [vmem:[#allocation9 + $0x8] sm:$0xff] %v428_v32  ;;  %v430_v42 = vadd.f32 %v414_v36, %v126_v35  ;;  %v106_v49 = vmul.f32 0.5, %v105_v31  ;;  %v613_v50 = vadd.f32 %v597_v34, %v581_v38  ;;  %vm99_vm5 = vcmp.lt.s32.totalorder %v98_v51, 16  ;;  %v1183_v30 = vld [vmem:[#allocation6 + $0x38] sm:$0xff]  ;;  %v1185_v31 = vld [vmem:[#allocation6 + $0x40] sm:$0xff]  ;;  %v1187_v32 = vld [vmem:[#allocation6 + $0x48] sm:$0xff] }
  0x63   :  { %445 = vst [vmem:[#allocation9 + $0x10] sm:$0xff] %v429_v37  ;;  %v614_v52 = vadd.f32 %v598_v41, %v582_v40  ;;  %v615_v57 = vadd.f32 %v599_v45, %v583_v44  ;;  %v628_v58 = vmul.f32 0.5, %v612_v46  ;;  %v175_v33 = vand.u32 2147483647, %v1177_v27  ;;  %v1190_v34 = vld [vmem:[#allocation6 + $0x50] sm:$0xff]  ;;  %v1197_v40 = vld [vmem:[#allocation6 + $0x58] sm:$0xff] }
  0x64   :  { %446 = vst [vmem:[#allocation9 + $0x18] sm:$0xff] %v430_v42  ;;  %v629_v63 = vmul.f32 0.5, %v613_v50  ;;  %v176_v35 = vand.u32 2147483647, %v1179_v28  ;;  %v177_v36 = vand.u32 2147483647, %v1181_v29 }
  0x65   :  { %v630_v2 = vmul.f32 0.5, %v614_v52  ;;  %v631_v10 = vmul.f32 0.5, %v615_v57  ;;  %v178_v37 = vand.u32 2147483647, %v1183_v30  ;;  %v179_v38 = vand.u32 2147483647, %v1185_v31 }
  0x66   :  { %v815_v43 = vpop.eup %814  ;;  %v180_v39 = vand.u32 2147483647, %v1187_v32  ;;  %v191_v41 = vsub.f32 0.0, %v175_v33  ;;  %v1199_v42 = vld [vmem:[#allocation6 + $0x60] sm:$0xff]  ;;  %v181_v44 = vand.u32 2147483647, %v1190_v34 }
  0x67   :  { %v101_v47 = vmul.f32 0.6931472, %v815_v43  ;;  %v817_v53 = vpop.eup %816  ;;  %v1201_v43 = vld [vmem:[#allocation6 + $0x68] sm:$0xff]  ;;  %v192_v45 = vsub.f32 0.0, %v176_v35  ;;  %v193_v46 = vsub.f32 0.0, %v177_v36  ;;  %v1204_v50 = vld [vmem:[#allocation6 + $0x70] sm:$0xff] }
  0x68   :  { %v819_v55 = vpop.eup %818  ;;  %v533_v56 = vmul.f32 0.6931472, %v817_v53  ;;  %v182_v51 = vand.u32 2147483647, %v1197_v40  ;;  %v196_v52 = vsub.f32 0.0, %v180_v39 }
  0x69   :  { %v102_v54 = vsub.f32 0.0, %v101_v47  ;;  %v821_v60 = vpop.eup %820  ;;  %v535_v62 = vmul.f32 0.6931472, %v819_v55  ;;  %v194_v47 = vsub.f32 0.0, %v178_v37  ;;  %v183_v53 = vand.u32 2147483647, %v1199_v42 }
  0x6a   :  { %v537_v0 = vmul.f32 0.6931472, %v821_v60  ;;  %v564_v1 = vsub.f32 0.0, %v533_v56  ;;  %v823_v3 = vpop.eup %822  ;;  %v211_v55 = vmul.f32 1.442695, %v191_v41 }
  0x6b   :  { %v107_v61 = vadd.f32 %v106_v49, %v102_v54  ;;  %v565_v7 = vsub.f32 0.0, %v535_v62  ;;  %v539_v8 = vmul.f32 0.6931472, %v823_v3  ;;  %v195_v49 = vsub.f32 0.0, %v179_v38 }
  0x6c   :  { %v566_v9 = vsub.f32 0.0, %v537_v0  ;;  %v644_v11 = vadd.f32 %v628_v58, %v564_v1  ;;  %v184_v54 = vand.u32 2147483647, %v1201_v43  ;;  %v213_v56 = vmul.f32 1.442695, %v192_v45 }
  0x6d   :  { %v765_v5 = vadd.f32 -0.5, %v107_v61  ;;  %v645_v4 = vadd.f32 %v629_v63, %v565_v7  ;;  %v567_v14 = vsub.f32 0.0, %v539_v8  ;;  %v215_v57 = vmul.f32 1.442695, %v193_v46 }
  0x6e   :  { %v646_v15 = vadd.f32 %v630_v2, %v566_v9  ;;  %v766_v16 = vadd.f32 -0.5, %v644_v11  ;;  %v217_v58 = vmul.f32 1.442695, %v194_v47  ;;  %v185_v60 = vand.u32 2147483647, %v1204_v50  ;;  %v1210_v2 = vld [vmem:[#allocation6 + $0x78] sm:$0xff] }
  0x6f   :  { %v109_v12 = vsel %vm99_vm5, %v765_v5, 0.0  ;;  %v767_v17 = vadd.f32 -0.5, %v645_v4  ;;  %v647_v18 = vadd.f32 %v631_v10, %v567_v14  ;;  %v197_v61 = vsub.f32 0.0, %v181_v44 }
  0x70   :  { %v111_v13 = vsel %vm110_vm6, %v109_v12, 0.0  ;;  %v768_v19 = vadd.f32 -0.5, %v646_v15  ;;  %v676_v20 = vsel %vm99_vm5, %v766_v16, 0.0  ;;  %824 = vpow2.f32 %v211_v55 }
  0x71   :  { %112 = vadd.xlane.f32.xlu0 %v111_v13  ;;  %v677_v21 = vsel %vm99_vm5, %v767_v17, 0.0  ;;  %v769_v6 = vadd.f32 -0.5, %v647_v18  ;;  %v219_v62 = vmul.f32 1.442695, %v195_v49  ;;  %v198_v63 = vsub.f32 0.0, %v182_v51 }
  0x72   :  { %v678_v22 = vsel %vm99_vm5, %v768_v19, 0.0  ;;  %v693_v23 = vadd.f32 %v677_v21, %v676_v20  ;;  %826 = vpow2.f32 %v213_v56  ;;  %v221_v0 = vmul.f32 1.442695, %v196_v52 }
  0x73   :  { %v679_v24 = vsel %vm99_vm5, %v769_v6, 0.0  ;;  %v199_v1 = vsub.f32 0.0, %v183_v53  ;;  %828 = vpow2.f32 %v215_v57  ;;  %v200_v3 = vsub.f32 0.0, %v184_v54 }
  0x74   :  { %v694_v25 = vadd.f32 %v693_v23, %v678_v22  ;;  %830 = vpow2.f32 %v217_v58  ;;  %v201_v5 = vsub.f32 0.0, %v185_v60  ;;  %v223_v7 = vmul.f32 1.442695, %v197_v61 }
  0x75   :  { %832 = vpow2.f32 %v219_v62  ;;  %v225_v8 = vmul.f32 1.442695, %v198_v63  ;;  %v186_v9 = vand.u32 2147483647, %v1210_v2  ;;  %v227_v10 = vmul.f32 1.442695, %v199_v1 }
  0x76   :  { %v695_v26 = vadd.f32 %v694_v25, %v679_v24  ;;  %834 = vpow2.f32 %v221_v0  ;;  %v229_v11 = vmul.f32 1.442695, %v200_v3  ;;  %v231_v12 = vmul.f32 1.442695, %v201_v5 }
  0x77   :  { %836 = vpow2.f32 %v223_v7  ;;  %v202_v13 = vsub.f32 0.0, %v186_v9  ;;  %v159_v56 = vmax.f32 %v1177_v27, 0.0  ;;  %v160_v57 = vmax.f32 %v1179_v28, 0.0 }
  0x78   :  { %708 = vadd.xlane.f32.xlu0 %v695_v26  ;;  %838 = vpow2.f32 %v225_v8  ;;  %v161_v58 = vmax.f32 %v1181_v29, 0.0  ;;  %v162_v62 = vmax.f32 %v1183_v30, 0.0  ;;  %v163_v63 = vmax.f32 %v1185_v31, 0.0 }
  0x79   :  { %840 = vpow2.f32 %v227_v10  ;;  %v233_v21 = vmul.f32 1.442695, %v202_v13  ;;  %v164_v0 = vmax.f32 %v1187_v32, 0.0  ;;  %v165_v1 = vmax.f32 %v1190_v34, 0.0 }
  0x7a   :  { %v825_v4 = vpop.eup %824  ;;  %842 = vpow2.f32 %v229_v11  ;;  %v166_v5 = vmax.f32 %v1197_v40, 0.0  ;;  %v167_v7 = vmax.f32 %v1199_v42, 0.0  ;;  %v168_v13 = vmax.f32 %v1201_v43, 0.0 }
  0x7b   :  { %v271_v15 = vadd.f32 1.0, %v825_v4  ;;  %844 = vpow2.f32 %v231_v12  ;;  %v274_v24 = vmul.f32 -0.5, %v825_v4  ;;  %v277_v44 = vand.u32 2147483647, %v825_v4 }
  0x7c   :  { %v827_v14 = vpop.eup %826 }
  0x7d   :  { %v1213_v16 = vpop.eup %828  ;;  %v280_v17 = vadd.f32 1.0, %v827_v14  ;;  %846 = vlog2.f32 %v271_v15  ;;  %v283_v25 = vmul.f32 -0.5, %v827_v14  ;;  %v275_v36 = vadd.f32 1.0, %v274_v24 }
  0x7e   :  { %v1215_v18 = vpop.eup %830  ;;  %v289_v19 = vadd.f32 1.0, %v1213_v16  ;;  %v292_v26 = vmul.f32 -0.5, %v1213_v16  ;;  %v286_v53 = vand.u32 2147483647, %v827_v14  ;;  %v295_v54 = vand.u32 2147483647, %v1213_v16 }
  0x7f   :  { %v1218_v20 = vpop.eup %832  ;;  %848 = vlog2.f32 %v280_v17  ;;  %v298_v6 = vadd.f32 1.0, %v1215_v18  ;;  %v284_v37 = vadd.f32 1.0, %v283_v25  ;;  %v301_v38 = vmul.f32 -0.5, %v1215_v18 }
  0x80   :  { %v1221_v22 = vpop.eup %834  ;;  %850 = vlog2.f32 %v289_v19  ;;  %v307_v23 = vadd.f32 1.0, %v1218_v20  ;;  %v293_v45 = vadd.f32 1.0, %v292_v26  ;;  %v310_v46 = vmul.f32 -0.5, %v1218_v20 }
  0x81   :  { %852 = vlog2.f32 %v298_v6  ;;  %v316_v33 = vadd.f32 1.0, %v1221_v22  ;;  %v1226_v35 = vpop.eup %836  ;;  %v319_v47 = vmul.f32 -0.5, %v1221_v22  ;;  %v276_v51 = vmul.f32 %v825_v4, %v275_v36 }
  0x82   :  { %854 = vlog2.f32 %v307_v23  ;;  %v1229_v39 = vpop.eup %838  ;;  %v285_v52 = vmul.f32 %v827_v14, %v284_v37  ;;  %v302_v60 = vadd.f32 1.0, %v301_v38  ;;  %vm1249_vm7 = vcmp.lt.f32.partialorder %v277_v44, 0.0004427343 }
  0x83   :  { %856 = vpow2.f32 %v233_v21  ;;  %v1231_v41 = vpop.eup %840  ;;  %vm1253_vm8 = vcmp.lt.f32.partialorder %v286_v53, 0.0004427343  ;;  %v1258_v11 = vmul.f32 %v1213_v16, %v293_v45  ;;  %v304_v12 = vand.u32 2147483647, %v1215_v18 }
  0x84   :  { %858 = vlog2.f32 %v316_v33  ;;  %v1235_v49 = vpop.eup %842  ;;  %v169_v14 = vmax.f32 %v1204_v50, 0.0  ;;  %v1264_v15 = vmul.f32 %v1215_v18, %v302_v60  ;;  %v311_v17 = vadd.f32 1.0, %v310_v46 }
  0x85   :  { %v1238_v55 = vpop.eup %844  ;;  %vm1268_vm9 = vcmp.lt.f32.partialorder %v295_v54, 0.0004427343  ;;  %v320_v16 = vadd.f32 1.0, %v319_v47  ;;  %vm1276_vm10 = vcmp.lt.f32.partialorder %v304_v12, 0.0004427343  ;;  %v325_v33 = vadd.f32 1.0, %v1226_v35 }
  0x86   :  { %v1284_v38 = vmul.f32 %v1218_v20, %v311_v17  ;;  %v328_v45 = vmul.f32 -0.5, %v1226_v35  ;;  %v313_v46 = vand.u32 2147483647, %v1218_v20  ;;  %v334_v53 = vadd.f32 1.0, %v1229_v39 }
  0x87   :  { %v847_v61 = vpop.eup %846  ;;  %v1287_v44 = vmul.f32 %v1221_v22, %v320_v16  ;;  %860 = vlog2.f32 %v325_v33  ;;  %v337_v54 = vmul.f32 -0.5, %v1229_v39  ;;  %v340_v28 = vand.u32 2147483647, %v1229_v39 }
  0x88   :  { %v273_v27 = vmul.f32 0.6931472, %v847_v61  ;;  %vm1300_vm11 = vcmp.lt.f32.partialorder %v313_v46, 0.0004427343  ;;  %862 = vlog2.f32 %v334_v53  ;;  %v346_v12 = vmul.f32 -0.5, %v1231_v41  ;;  %v400_v53 = vld [vmem:[#allocation8 + $0x28] sm:$0xff] }
  0x89   :  { %v849_v3 = vpop.eup %848  ;;  %v338_v10 = vadd.f32 1.0, %v337_v54  ;;  %v355_v17 = vmul.f32 -0.5, %v1235_v49  ;;  %vm1332_vm14 = vcmp.lt.f32.partialorder %v340_v28, 0.0004427343  ;;  %v367_v46 = vand.u32 2147483647, %v1238_v55 }
  0x8a   :  { %v851_v8 = vpop.eup %850  ;;  %v282_v9 = vmul.f32 0.6931472, %v849_v3  ;;  %v279_v21 = vsel %vm1249_vm7, %v276_v51, %v273_v27  ;;  %v322_v51 = vand.u32 2147483647, %v1221_v22  ;;  %v329_v22 = vadd.f32 1.0, %v328_v45  ;;  %v128_v28 = vld [vmem:[#allocation2 + $0x28] sm:$0xff] }
  0x8b   :  { %v853_v4 = vpop.eup %852  ;;  %v291_v6 = vmul.f32 0.6931472, %v851_v8  ;;  %v383_v60 = vadd.f32 %v279_v21, %v159_v56  ;;  %v331_v56 = vand.u32 2147483647, %v1226_v35  ;;  %v361_v21 = vadd.f32 1.0, %v1238_v55 }
  0x8c   :  { %v855_v19 = vpop.eup %854  ;;  %v288_v25 = vsel %vm1253_vm8, %v285_v52, %v282_v9  ;;  %v300_v26 = vmul.f32 0.6931472, %v853_v4  ;;  %vm1304_vm12 = vcmp.lt.f32.partialorder %v322_v51, 0.0004427343  ;;  %v349_v4 = vand.u32 2147483647, %v1231_v41 }
  0x8d   :  { %v1272_v24 = vpop.eup %856  ;;  %v1281_v37 = vmul.f32 0.6931472, %v855_v19  ;;  %v297_v52 = vsel %vm1268_vm9, %v1258_v11, %v291_v6  ;;  %v384_v8 = vadd.f32 %v288_v25, %v160_v57  ;;  %v343_v11 = vadd.f32 1.0, %v1231_v41  ;;  %v399_v51 = vld [vmem:[#allocation8 + $0x20] sm:$0xff] }
  0x8e   :  { %v859_v36 = vpop.eup %858  ;;  %v306_v61 = vsel %vm1276_vm10, %v1264_v15, %v300_v26  ;;  %v352_v15 = vadd.f32 1.0, %v1235_v49  ;;  %v330_v19 = vmul.f32 %v1226_v35, %v329_v22  ;;  %v358_v57 = vand.u32 2147483647, %v1235_v49  ;;  %v401_v22 = vld [vmem:[#allocation8 + $0x30] sm:$0xff] }
  0x8f   :  { %v318_v47 = vmul.f32 0.6931472, %v859_v36  ;;  %v315_v27 = vsel %vm1300_vm11, %v1284_v38, %v1281_v37  ;;  %864 = vlog2.f32 %v343_v11  ;;  %vm1325_vm13 = vcmp.lt.f32.partialorder %v331_v56, 0.0004427343  ;;  %v127_v38 = vld [vmem:[#allocation2 + $0x20] sm:$0xff]  ;;  %v402_v56 = vld [vmem:[#allocation8 + $0x38] sm:$0xff] }
  0x90   :  { %v347_v23 = vadd.f32 1.0, %v346_v12  ;;  %866 = vlog2.f32 %v352_v15  ;;  %v356_v16 = vadd.f32 1.0, %v355_v17  ;;  %v1330_v25 = vmul.f32 %v1229_v39, %v338_v10  ;;  %v129_v10 = vld [vmem:[#allocation2 + $0x30] sm:$0xff] }
  0x91   :  { %v324_v9 = vsel %vm1304_vm12, %v1287_v44, %v318_v47  ;;  %868 = vlog2.f32 %v361_v21  ;;  %v364_v35 = vmul.f32 -0.5, %v1238_v55  ;;  %vm1337_vm15 = vcmp.lt.f32.partialorder %v349_v4, 0.0004427343  ;;  %v861_v37 = vpop.eup %860  ;;  %v131_v4 = vld [vmem:[#allocation2 + $0x40] sm:$0xff]  ;;  %v132_v21 = vld [vmem:[#allocation2 + $0x48] sm:$0xff] }
  0x92   :  { %vm1341_vm0 = vcmp.lt.f32.partialorder %v358_v57, 0.0004427343  ;;  %v370_v36 = vadd.f32 1.0, %v1272_v24  ;;  %v373_v39 = vmul.f32 -0.5, %v1272_v24  ;;  %v1348_v44 = vmul.f32 %v1231_v41, %v347_v23  ;;  %v403_v41 = vld [vmem:[#allocation8 + $0x40] sm:$0xff]  ;;  %v863_v57 = vpop.eup %862 }
  0x93   :  { %v365_v45 = vadd.f32 1.0, %v364_v35  ;;  %v385_v47 = vadd.f32 %v297_v52, %v161_v58  ;;  %v327_v54 = vmul.f32 0.6931472, %v861_v37  ;;  %v1354_v3 = vmul.f32 %v1235_v49, %v356_v16  ;;  %v404_v49 = vld [vmem:[#allocation8 + $0x48] sm:$0xff]  ;;  %v130_v52 = vld [vmem:[#allocation2 + $0x38] sm:$0xff] }
  0x94   :  { %870 = vlog2.f32 %v370_v36  ;;  %v386_v20 = vadd.f32 %v306_v61, %v162_v62  ;;  %v374_v11 = vadd.f32 1.0, %v373_v39  ;;  %v376_v12 = vand.u32 2147483647, %v1272_v24  ;;  %v405_v61 = vld [vmem:[#allocation8 + $0x50] sm:$0xff]  ;;  %v406_v37 = vld [vmem:[#allocation8 + $0x58] sm:$0xff] }
  0x95   :  { %v387_v29 = vadd.f32 %v315_v27, %v163_v63  ;;  %v388_v58 = vadd.f32 %v324_v9, %v164_v0  ;;  %v333_v30 = vsel %vm1325_vm13, %v330_v19, %v327_v54  ;;  %v1366_v62 = vmul.f32 %v1238_v55, %v365_v45  ;;  %v93_v27 = vld [vmem:[%s1461_s5] sm:$0x1]  ;;  %v133_v9 = vld [vmem:[#allocation2 + $0x50] sm:$0xff]  ;;  %s938_s5 = scalar_lea.vmem %s1387_s25, 16 }
  0x96   :  { %v415_v15 = vmul.f32 %v399_v51, %v383_v60  ;;  %v416_v17 = vmul.f32 %v400_v53, %v384_v8  ;;  %v389_v31 = vadd.f32 %v333_v30, %v165_v1  ;;  %v417_v63 = vmul.f32 %v401_v22, %v385_v47  ;;  %p939_p10 = scmp.ne.s32.totalorder %s1387_s25, %s938_s5  ;;  %p944_p12 = scmp.lt.s32.totalorder %s942_s26, %s938_s5 }
  0x97   :  { %v418_v32 = vmul.f32 %v402_v56, %v386_v20  ;;  %v419_v0 = vmul.f32 %v403_v41, %v387_v29  ;;  %v336_v19 = vmul.f32 0.6931472, %v863_v57  ;;  %v420_v6 = vmul.f32 %v404_v49, %v388_v58  ;;  %v408_v41 = vld [vmem:[#allocation8 + $0x68] sm:$0xff] }
  0x98   :  { %v431_v55 = vadd.f32 %v415_v15, %v127_v38  ;;  %v432_v23 = vadd.f32 %v416_v17, %v128_v28  ;;  %v421_v60 = vmul.f32 %v405_v61, %v389_v31  ;;  %v433_v8 = vadd.f32 %v417_v63, %v129_v10  ;;  %v136_v10 = vld [vmem:[#allocation2 + $0x68] sm:$0xff]  ;;  %p945_p13 = por %p944_p12, %p943_p11 }
  0x99   :  { %v865_v16 = vpop.eup %864  ;;  %v434_v35 = vadd.f32 %v418_v32, %v130_v52  ;;  %v435_v36 = vadd.f32 %v419_v0, %v131_v4  ;;  %v342_v1 = vsel %vm1332_vm14, %v1330_v25, %v336_v19  ;;  %v436_v45 = vadd.f32 %v420_v6, %v132_v21  ;;  %v134_v25 = vld [vmem:[#allocation2 + $0x58] sm:$0xff] }
  0x9a   :  { %v867_v34 = vpop.eup %866  ;;  %v345_v39 = vmul.f32 0.6931472, %v865_v16  ;;  %447 = vst [vmem:[#allocation9 + $0x20] sm:$0xff] %v431_v55  ;;  %448 = vst [vmem:[#allocation9 + $0x28] sm:$0xff] %v432_v23  ;;  %v94_v38 = vmul.f32 %v93_v27, %v1143_v59  ;;  %vm1377_vm1 = vcmp.lt.f32.partialorder %v367_v46, 0.0004427343  ;;  %v390_v54 = vadd.f32 %v342_v1, %v166_v5  ;;  %p946_p0 = pnand %p945_p13, %p939_p10 }
  0x9b   :  { %v869_v47 = vpop.eup %868  ;;  %v354_v51 = vmul.f32 0.6931472, %v867_v34  ;;  %v437_v20 = vadd.f32 %v421_v60, %v133_v9  ;;  %449 = vst [vmem:[#allocation9 + $0x30] sm:$0xff] %v433_v8  ;;  %450 = vst [vmem:[#allocation9 + $0x38] sm:$0xff] %v434_v35  ;;  %v407_v59 = vld [vmem:[#allocation8 + $0x60] sm:$0xff]  ;;  %v375_v5 = vmul.f32 %v1272_v24, %v374_v11  ;;  %v170_v28 = vmax.f32 %v1210_v2, 0.0 }
  0x9c   :  { %451 = vst [vmem:[#allocation9 + $0x40] sm:$0xff] %v435_v36  ;;  %v351_v26 = vsel %vm1337_vm15, %v1348_v44, %v345_v39  ;;  %v363_v22 = vmul.f32 0.6931472, %v869_v47  ;;  %452 = vst [vmem:[#allocation9 + $0x48] sm:$0xff] %v436_v45  ;;  %v95_v46 = vadd.f32 %v94_v38, %v1133_v48  ;;  %v422_v18 = vmul.f32 %v406_v37, %v390_v54  ;;  %v135_v48 = vld [vmem:[#allocation2 + $0x60] sm:$0xff] }
  0x9d   :  { %v360_v40 = vsel %vm1341_vm0, %v1354_v3, %v354_v51  ;;  %v391_v56 = vadd.f32 %v351_v26, %v167_v7  ;;  %453 = vst [vmem:[#allocation9 + $0x50] sm:$0xff] %v437_v20  ;;  %vm1401_vm2 = vcmp.lt.f32.partialorder %v376_v12, 0.0004427343  ;;  %v409_v3 = vld [vmem:[#allocation8 + $0x70] sm:$0xff] }
  0x9e   :  { %v871_v44 = vpop.eup %870  ;;  %v369_v33 = vsel %vm1377_vm1, %v1366_v62, %v363_v22  ;;  %v392_v7 = vadd.f32 %v360_v40, %v168_v13  ;;  %96 = vst [vmem:[#allocation10] sm:$0x1] %v95_v46  ;;  %v438_v58 = vadd.f32 %v422_v18, %v134_v25 }
  0x9f   :  { %v372_v11 = vmul.f32 0.6931472, %v871_v44  ;;  %v393_v2 = vadd.f32 %v369_v33, %v169_v14  ;;  %v423_v29 = vmul.f32 %v407_v59, %v391_v56 }
  0xa0   :  { %949 = shalt.err (!%p946_p0)
}
  0xa1   :  { %s950_s1 = scalar_lea.hbm %s1463_s7, 16 }
  0xa2   :  { %p951_p1 = scmp.ne.s32.totalorder %s1463_s7, %s950_s1  ;;  %p954_p2 = scmp.lt.u32.totalorder %s950_s1, %s1463_s7 }
  0xa4   :  { %p956_p3 = pnand %p954_p2, %p951_p1 }
  0xa6   :  { %959 = shalt.err (!%p956_p3)
}
  0xa7   :  { %741 = dma.vmem_to_hbm [thread:$0]  %s1387_s25, 16, %s1463_s7, [#allocation11]   ;;  %v137_v43 = vld [vmem:[#allocation2 + $0x70] sm:$0xff]  ;;  %v424_v50 = vmul.f32 %v408_v41, %v392_v7  ;;  %v378_v13 = vsel %vm1401_vm2, %v375_v5, %v372_v11  ;;  %v410_v14 = vld [vmem:[#allocation8 + $0x78] sm:$0xff]  ;;  %v425_v24 = vmul.f32 %v409_v3, %v393_v2  ;;  %v439_v12 = vadd.f32 %v423_v29, %v135_v48  ;;  %454 = vst [vmem:[#allocation9 + $0x58] sm:$0xff] %v438_v58 }
  0xa8   :  { %v394_v49 = vadd.f32 %v378_v13, %v170_v28  ;;  %v138_v4 = vld [vmem:[#allocation2 + $0x78] sm:$0xff]  ;;  %s1008_s14 = smov [#allocation9]  }
  0xa9   :  { %v440_v52 = vadd.f32 %v424_v50, %v136_v10  ;;  %v441_v30 = vadd.f32 %v425_v24, %v137_v43  ;;  %455 = vst [vmem:[#allocation9 + $0x60] sm:$0xff] %v439_v12  ;;  %s725_s15 = sshll.u32 %s1008_s14, 4  ;;  %s726_s15 = int_to_ptr.vmem [resolvable:$true] %s725_s15 }
  0xaa   :  { %v426_v62 = vmul.f32 %v410_v14, %v394_v49  ;;  %s960_s7 = scalar_lea.vmem %s726_s15, 2048  ;;  %p965_p5 = scmp.lt.s32.totalorder %s726_s15, %s726_s15 }
  0xab   :  { %456 = vst [vmem:[#allocation9 + $0x68] sm:$0xff] %v440_v52  ;;  %457 = vst [vmem:[#allocation9 + $0x70] sm:$0xff] %v441_v30  ;;  %p961_p4 = scmp.ne.s32.totalorder %s726_s15, %s960_s7  ;;  %p966_p6 = scmp.lt.s32.totalorder %s960_s7, %s960_s7 }
  0xac   :  { %v442_v61 = vadd.f32 %v426_v62, %v138_v4 }
  0xad   :  { %p967_p7 = por %p966_p6, %p965_p5 }
  0xae   :  { %458 = vst [vmem:[#allocation9 + $0x78] sm:$0xff] %v442_v61 }
  0xaf   :  { %p968_p8 = pnand %p967_p7, %p961_p4 }
  0xb1   :  { %971 = shalt.err (!%p968_p8)
}
  0xb2   :  { %s972_s20 = scalar_lea.hbm %s1462_s6, 2048 }
  0xb3   :  { %p973_p9 = scmp.ne.s32.totalorder %s1462_s6, %s972_s20  ;;  %p976_p10 = scmp.lt.u32.totalorder %s972_s20, %s1462_s6 }
  0xb5   :  { %p978_p11 = pnand %p976_p10, %p973_p9 }
  0xb7   :  { %981 = shalt.err (!%p978_p11)
}
  0xb8   :  { %731 = dma.vmem_to_hbm [thread:$0]  %s726_s15, 2048, %s1462_s6, [#allocation4], %s1004_s17, %s1004_s17, %s1005_s18  }
  0xb9   :  { %s982_s18 = scalar_lea.hbm %s1464_s8, 16 }
  0xba   :  { %p983_p12 = scmp.ne.s32.totalorder %s1464_s8, %s982_s18  ;;  %p986_p13 = scmp.lt.u32.totalorder %s982_s18, %s1464_s8 }
  0xbc   :  { %p988_p0 = pnand %p986_p13, %p983_p12 }
  0xfe   :  { %v113_v15 = vpop.xlane.xlu0 %112 }
  0xff   :  { %v114_v17 = vrot.slane %v113_v15, 4 }
 0x101   :  { %v115_v57 = vadd.f32 %v114_v17, %v113_v15 }
 0x103   :  { %v116_v21 = vrot.slane %v115_v57, 2 }
 0x105   :  { %v117_v31 = vadd.f32 %v116_v21, %v115_v57  ;;  %v709_v63 = vpop.xlane.xlu0 %708 }
 0x106   :  { %v710_v0 = vrot.slane %v709_v63, 4 }
 0x107   :  { %v118_v32 = vrot.slane %v117_v31, 1 }
 0x108   :  { %v711_v9 = vadd.f32 %v710_v0, %v709_v63 }
 0x109   :  { %v119_v27 = vadd.f32 %v118_v32, %v117_v31 }
 0x10a   :  { %v712_v19 = vrot.slane %v711_v9, 2 }
 0x10b   :  { %782 = vpush %v119_v27 }
 0x10c   :  { %v713_v6 = vadd.f32 %v712_v19, %v711_v9 }
 0x10e   :  { %v714_v55 = vrot.slane %v713_v6, 1 }
 0x110   :  { %v715_v23 = vadd.f32 %v714_v55, %v713_v6 }
 0x112   :  { %784 = vpush %v715_v23 }
 0x13c   :  { %s783_s3 = spop %782 }
 0x143   :  { %s785_s23 = spop %784 }
 0x144   :  { %s717_s24 = sadd.f32 %s785_s23, %s783_s3 }
 0x146   :  { %719 = sst [smem:[#allocation12]] %s717_s24 }
 0x147   :  { %991 = shalt.err (!%p988_p0)
}
 0x148   :  { %s1009_s29 = smov [#allocation12]  }
 0x149   :  { %749 = dma.smem_to_hbm %s1009_s29, 16, %s1464_s8, [#allocation5]  }
 0x14a   :  { %996 = dma.done.wait [#allocation4], 2048  }
 0x14b   :  { %997 = vsyncadd [#allocation4], 4294965248 }
 0x14c   :  { %998 = dma.done.wait [#allocation11], 16  }
 0x14d   :  { %999 = vsyncadd [#allocation11], 4294967280 }
 0x14e   :  { %1000 = dma.done.wait [#allocation5], 16  }
 0x14f   :  { %1001 = vsyncadd [#allocation5], 4294967280 }
 0x150   :  { %759 = sfence }
 0x151   :  { %760 = vsyncpa [#allocation3], 1 }
 0x152   :  { %761 = vsyncpa [#allocation7], 1 }
 0x153   :  { %762 = vsyncpa [#allocation4], 1 }
 0x154   :  { %763 = vsyncpa [#allocation11], 1 }
 0x155   :  { %764 = vsyncpa [#allocation5], 1 }

</bundles_post_ra>
